<compile_context>
chip_gen: v7x
topology: tpu7x:2x2x1
jax: 0.10.0
libtpu: 0.0.40
codegen_flags: <defaults>
</compile_context>

<pallas_src>
import jax
import jax.numpy as jnp
from jax import lax
from jax.experimental import pallas as pl
from jax.experimental.pallas import tpu as pltpu

_LANES = 128
_EW_MAX_ROWS = 2048   # 2048 x 128 x 4 B = 1 MiB per elementwise block
_MXU_TILE = 512       # 512-wide MXU tiles (~6 MiB pipelined VMEM in f32)


def _ceil_to(v, m):
    return pl.cdiv(v, m) * m


def _pad_to(a, target, axis):
    pad = target - a.shape[axis]
    if pad == 0:
        return a
    widths = [(0, 0)] * a.ndim
    widths[axis] = (0, pad)
    return jnp.pad(a, widths)


# ---------------------------------------------------------------------------
# Path 1: in_size == 1 and out_features == 1 (the module's actual config).
# ---------------------------------------------------------------------------
def _logreg_vpu_kernel(x_ref, wb_ref, o_ref):
    w = wb_ref[0]          # scalar weight from SMEM
    b = wb_ref[1]          # scalar bias from SMEM
    o_ref[...] = jax.nn.sigmoid(x_ref[...] * w + b).astype(o_ref.dtype)


def _forward_elementwise(x, weight, bias):
    """sigmoid(w*x + b): lane-dense over batch, VPU+EUP only, HBM-bound."""
    B = x.shape[0]
    out_dtype = x.dtype
    x_flat = x.reshape(-1).astype(jnp.float32)

    rows = pl.cdiv(B, _LANES)
    if B % _LANES != 0:
        # Only non-metadata copy on this path: pad to the next lane multiple.
        x_flat = jnp.pad(x_flat, (0, rows * _LANES - B))
    x2d = x_flat.reshape(rows, _LANES)

    # Scalar weight & bias together in SMEM: no VMEM DMAs, no (1,1) broadcast.
    wb = jnp.stack([weight.reshape(()), bias.reshape(())]).astype(jnp.float32)

    if rows <= _EW_MAX_ROWS:
        tr = rows                      # full-dim block: always layout-legal
    else:
        tr = _EW_MAX_ROWS              # 1 MiB blocks; tail block masked by Pallas
    grid = (pl.cdiv(rows, tr),)

    out2d = pl.pallas_call(
        _logreg_vpu_kernel,
        out_shape=jax.ShapeDtypeStruct((rows, _LANES), out_dtype),
        grid=grid,
        in_specs=[
            pl.BlockSpec((tr, _LANES), lambda i: (i, 0)),
            pl.BlockSpec(memory_space=pltpu.MemorySpace.SMEM),
        ],
        out_specs=pl.BlockSpec((tr, _LANES), lambda i: (i, 0)),
        compiler_params=pltpu.CompilerParams(
            dimension_semantics=("parallel",)),
        cost_estimate=pl.CostEstimate(
            flops=2 * B, transcendentals=B, bytes_accessed=8 * B),
    )(x2d, wb)

    if B % _LANES == 0:
        return out2d.reshape(B, 1)                 # metadata-only reshape
    return out2d.reshape(-1)[:B].reshape(B, 1)


# ---------------------------------------------------------------------------
# Path 2: general (B, K) @ (K, N) + bias -> sigmoid, tiled on the MXU.
# ---------------------------------------------------------------------------
def _logreg_mxu_kernel(x_ref, w_ref, b_ref, o_ref):
    k = pl.program_id(2)
    # x: (tm, tk), w: (tn, tk) in native PyTorch layout; contract on dim 1.
    acc = lax.dot_general(
        x_ref[...], w_ref[...],
        dimension_numbers=(((1,), (1,)), ((), ())),
        preferred_element_type=jnp.float32)

    @pl.when(k == 0)
    def _():
        o_ref[...] = acc               # f32 output block doubles as accumulator

    @pl.when(k > 0)
    def _():
        o_ref[...] += acc

    @pl.when(k == pl.num_programs(2) - 1)
    def _():
        o_ref[...] = jax.nn.sigmoid(o_ref[...] + b_ref[...])


def _forward_matmul(x, weight, bias, *, tile=_MXU_TILE, mxu_dtype=jnp.bfloat16):
    B, K = x.shape
    N = weight.shape[0]

    # M (batch): full-dim block if it fits one tile, else 512-row tiles + pad.
    if B <= tile:
        tm, m_pad = B, B
    else:
        tm, m_pad = tile, _ceil_to(B, tile)
    # N (features): full-dim block for small N -> no lane padding, no slice.
    if N <= tile:
        tn, n_pad = N, N
    else:
        tn, n_pad = tile, _ceil_to(N, tile)
    # K (reduction): zero-padded so padding never pollutes the accumulator.
    if K <= tile:
        tk, k_pad = K, K
    else:
        tk, k_pad = tile, _ceil_to(K, tile)

    x_p = _pad_to(_pad_to(x.astype(mxu_dtype), m_pad, 0), k_pad, 1)
    w_p = _pad_to(_pad_to(weight.astype(mxu_dtype), n_pad, 0), k_pad, 1)  # (N, K)
    b_p = _pad_to(bias.reshape(1, N).astype(jnp.float32), n_pad, 1)

    out_p = pl.pallas_call(
        _logreg_mxu_kernel,
        out_shape=jax.ShapeDtypeStruct((m_pad, n_pad), jnp.float32),
        grid=(m_pad // tm, n_pad // tn, k_pad // tk),
        in_specs=[
            pl.BlockSpec((tm, tk), lambda i, j, k: (i, k)),
            pl.BlockSpec((tn, tk), lambda i, j, k: (j, k)),
            pl.BlockSpec((1, tn), lambda i, j, k: (0, j)),
        ],
        out_specs=pl.BlockSpec((tm, tn), lambda i, j, k: (i, j)),
        compiler_params=pltpu.CompilerParams(
            dimension_semantics=("parallel", "parallel", "arbitrary")),
        cost_estimate=pl.CostEstimate(
            flops=2 * B * K * N, transcendentals=B * N,
            bytes_accessed=(x_p.size * x_p.dtype.itemsize
                            + w_p.size * w_p.dtype.itemsize
                            + 4 * (m_pad * n_pad + n_pad))),
    )(x_p, w_p, b_p)

    if m_pad == B and n_pad == N:
        return out_p
    return out_p[:B, :N]


def logistic_regression_forward(x, weight, bias, *, mxu_dtype=jnp.bfloat16):
    """sigmoid(x @ weight.T + bias); weight in PyTorch (out, in) layout."""
    in_size = x.shape[1]
    out_features = weight.shape[0]
    if in_size == 1 and out_features == 1:
        return _forward_elementwise(x, weight, bias)
    return _forward_matmul(x, weight, bias, mxu_dtype=mxu_dtype)


if __name__ == "__main__":
    key = jax.random.PRNGKey(0)
    k_w, k_b, k_x2, k_w2, k_b2, k_x3 = jax.random.split(key, 6)

    # --- Module config from the spec: logistic_regression(in_size=1, b=1) ---
    in_size, out_features = 1, 1
    bound = 1.0 / (in_size ** 0.5)
    weight = jax.random.uniform(k_w, (out_features, in_size),
                                minval=-bound, maxval=bound, dtype=jnp.float32)
    bias = jax.random.uniform(k_b, (out_features,),
                              minval=-bound, maxval=bound, dtype=jnp.float32)
    x = jnp.array([[1.0], [100.0]], dtype=jnp.float32)

    out = jax.block_until_ready(logistic_regression_forward(x, weight, bias))
    ref = jax.nn.sigmoid(x @ weight.T + bias[None, :])
    assert out.shape == (2, out_features)
    assert jnp.allclose(out, ref, atol=1e-6), (out, ref)

    # Elementwise path with a batch that is not a multiple of 128 (tail block).
    x3 = jax.random.normal(k_x3, (200, 1), dtype=jnp.float32) * 3.0
    out3 = jax.block_until_ready(logistic_regression_forward(x3, weight, bias))
    ref3 = jax.nn.sigmoid(x3 @ weight.T + bias[None, :])
    assert out3.shape == (200, 1)
    assert jnp.allclose(out3, ref3, atol=1e-6)

    # General tiled MXU path (default bf16 MXU inputs, f32 accumulate/epilogue).
    B2, K2, N2 = 96, 192, 64
    x2 = jax.random.normal(k_x2, (B2, K2), dtype=jnp.float32)
    w2 = jax.random.normal(k_w2, (N2, K2), dtype=jnp.float32) * 0.05
    b2 = jax.random.normal(k_b2, (N2,), dtype=jnp.float32) * 0.05
    ref2 = jax.nn.sigmoid(x2 @ w2.T + b2[None, :])

    out2_bf16 = jax.block_until_ready(logistic_regression_forward(x2, w2, b2))
    assert out2_bf16.shape == (B2, N2)
    assert jnp.allclose(out2_bf16, ref2, atol=2e-2), \
        float(jnp.max(jnp.abs(out2_bf16 - ref2)))

    out2_f32 = jax.block_until_ready(
        logistic_regression_forward(x2, w2, b2, mxu_dtype=jnp.float32))
    assert jnp.allclose(out2_f32, ref2, atol=1e-5, rtol=1e-5), \
        float(jnp.max(jnp.abs(out2_f32 - ref2)))

    print("KERNEL_OK")
</pallas_src>

<mosaic_0001>
module attributes {stable_mosaic.version = 11 : i64} {
  func.func @_logreg_vpu_kernel(%arg0: i32, %arg1: memref<1x128xf32, #tpu.memory_space<vmem>>, %arg2: memref<2xf32, #tpu.memory_space<smem>>, %arg3: memref<1x128xf32, #tpu.memory_space<vmem>>) attributes {dimension_semantics = [#tpu.dimension_semantics<parallel>], iteration_bounds = array<i64: 1>, scalar_prefetch = 0 : i64, scratch_operands = 0 : i64, tpu.core_type = #tpu.core_type<tc>, window_params = [{transform_indices = @transform_0, window_bounds = array<i64: 1, 128>}, {transform_indices = @transform_1, window_bounds = array<i64: 2>}, {transform_indices = @transform_2, window_bounds = array<i64: 1, 128>}]} {
    %c0 = arith.constant 0 : index
    %0 = memref.load %arg2[%c0] : memref<2xf32, #tpu.memory_space<smem>>
    %c1 = arith.constant 1 : index
    %1 = memref.load %arg2[%c1] : memref<2xf32, #tpu.memory_space<smem>>
    %c0_0 = arith.constant 0 : index
    %c0_1 = arith.constant 0 : index
    %2 = vector.load %arg1[%c0_0, %c0_1] : memref<1x128xf32, #tpu.memory_space<vmem>>, vector<1x128xf32>
    %3 = vector.broadcast %0 : f32 to vector<1x128xf32>
    %4 = arith.mulf %2, %3 : vector<1x128xf32>
    %5 = vector.broadcast %1 : f32 to vector<1x128xf32>
    %6 = arith.addf %4, %5 : vector<1x128xf32>
    %7 = arith.negf %6 : vector<1x128xf32>
    %8 = math.exp %7 : vector<1x128xf32>
    %cst = arith.constant 1.000000e+00 : f32
    %9 = vector.broadcast %cst : f32 to vector<1x128xf32>
    %10 = arith.addf %9, %8 : vector<1x128xf32>
    %11 = arith.divf %9, %10 : vector<1x128xf32>
    %c0_2 = arith.constant 0 : index
    %c0_3 = arith.constant 0 : index
    %12 = vector.load %arg3[%c0_2, %c0_3] : memref<1x128xf32, #tpu.memory_space<vmem>>, vector<1x128xf32>
    tpu.vector_store %arg3[%c0_2, %c0_3], %11 {strides = array<i32>} : memref<1x128xf32, #tpu.memory_space<vmem>>, vector<1x128xf32>,
    return
  }
  func.func @transform_0(%arg0: i32) -> (i32, i32) {
    %c0_i32 = arith.constant 0 : i32
    %c0_i32_0 = arith.constant 0 : i32
    return %arg0, %c0_i32 : i32, i32
  }
  func.func @transform_1(%arg0: i32) -> i32 {
    %c0_i32 = arith.constant 0 : i32
    %c0_i32_0 = arith.constant 0 : i32
    return %c0_i32 : i32
  }
  func.func @transform_2(%arg0: i32) -> (i32, i32) {
    %c0_i32 = arith.constant 0 : i32
    %c0_i32_0 = arith.constant 0 : i32
    return %arg0, %c0_i32 : i32, i32
  }
}

</mosaic_0001>

<bundles_post_ra>
// kernel: tpu_custom_call.1
= control target key start
LH: loop header
LB: loop body
LE: loop exit
PB: predicated region body
PF: predicated region fallthrough
CT: control target
= control target key end

     0   :  { %7 = vsyncpa [#allocation3], 0  ;;  %s183_s0 = inlined_call_operand.hbm [shape: f32[1,128], index: 0, kind: input, shape index: {}]   ;;  %s184_s1 = inlined_call_operand.vmem [shape: f32[2], index: 1, kind: input, shape index: {}]   ;;  %s185_s2 = inlined_call_operand.hbm [shape: f32[1,128], index: 2, kind: output, shape index: {}]  }
   0x1   :  { %8 = vsyncpa [#allocation5], 0 }
   0x2   :  { %9 = vsyncpa [#allocation4], 0  ;;  %s26_s11 = sshll.u32 %s184_s1, 4  ;;  %s138_s12 = smov [#allocation2]   ;;  %s27_s11 = int_to_ptr.vmem [resolvable:$true] %s26_s11 }
   0x3   :  { %s16_s13 = sshll.u32 %s138_s12, 4  ;;  %s76_s16 = scalar_lea.hbm %s183_s0, 16  ;;  %s17_s13 = int_to_ptr.vmem [resolvable:$true] %s16_s13 }
   0x4   :  { %p77_p0 = scmp.ne.s32.totalorder %s183_s0, %s76_s16  ;;  %p80_p1 = scmp.lt.u32.totalorder %s76_s16, %s183_s0 }
   0x6   :  { %p82_p2 = pnand %p80_p1, %p77_p0 }
   0x8   :  { %85 = shalt.err (!%p82_p2)
}
   0x9   :  { %s86_s21 = scalar_lea.vmem %s17_s13, 16  ;;  %s90_s1 = scalar_lea.vmem %s17_s13, 32 }
   0xa   :  { %p87_p3 = scmp.ne.s32.totalorder %s17_s13, %s86_s21  ;;  %p91_p4 = scmp.lt.s32.totalorder %s17_s13, %s17_s13 }
   0xb   :  { %p92_p5 = scmp.lt.s32.totalorder %s90_s1, %s86_s21 }
   0xd   :  { %p93_p6 = por %p92_p5, %p91_p4 }
   0xf   :  { %p94_p7 = pnand %p93_p6, %p87_p3 }
  0x11   :  { %97 = shalt.err (!%p94_p7)
}
  0x12   :  { %19 = dma.hbm_to_vmem [thread:$0]  %s183_s0, 16, %s17_s13, [#allocation3]  }
  0x13   :  { %s98_s24 = scalar_lea.vmem %s27_s11, 16  ;;  %p103_p9 = scmp.lt.s32.totalorder %s27_s11, %s27_s11 }
  0x14   :  { %p99_p8 = scmp.ne.s32.totalorder %s27_s11, %s98_s24  ;;  %p104_p10 = scmp.lt.s32.totalorder %s98_s24, %s98_s24 }
  0x16   :  { %p105_p11 = por %p104_p10, %p103_p9 }
  0x18   :  { %p106_p12 = pnand %p105_p11, %p99_p8 }
  0x1a   :  { %109 = shalt.err (!%p106_p12)
}
  0x1b   :  { %s139_s25 = smov [#allocation6]  }
  0x1c   :  { %29 = dma.vmem_to_smem %s27_s11, 16, %s139_s25, [#allocation5]  }
  0x1d   :  { %132 = dma.done.wait [#allocation3], 16  }
  0x1e   :  { %133 = vsyncadd [#allocation3], 4294967280 }
  0x1f   :  { %134 = dma.done.wait [#allocation5], 16  }
  0x20   :  { %135 = vsyncadd [#allocation5], 4294967280 }
  0x21   :  { %36 = sfence }
  0x22   :  { %s37_s26 = sld [smem:[#allocation6]]  ;;  %s67_s27 = sld [smem:[#allocation6 + $0x1]]  ;;  %v39_v0 = vld [vmem:[#allocation2] sm:$0x1] }
  0x23   :  { %s140_s0 = smov [#allocation7]  }
  0x24   :  { %s57_s28 = sshll.u32 %s140_s0, 4  ;;  %s58_s28 = int_to_ptr.vmem [resolvable:$true] %s57_s28 }
  0x25   :  { %s110_s29 = scalar_lea.vmem %s58_s28, 16  ;;  %s114_s30 = scalar_lea.vmem %s58_s28, 32 }
  0x26   :  { %p111_p13 = scmp.ne.s32.totalorder %s58_s28, %s110_s29  ;;  %p115_p0 = scmp.lt.s32.totalorder %s58_s28, %s58_s28 }
  0x27   :  { %p116_p1 = scmp.lt.s32.totalorder %s114_s30, %s110_s29 }
  0x28   :  { %v40_v1 = vstv %s37_s26  ;;  %v42_v2 = vstv %s67_s27 }
  0x29   :  { %v41_v3 = vmul.f32 %v40_v1, %v39_v0  ;;  %p117_p2 = por %p116_p1, %p115_p0 }
  0x2b   :  { %v43_v4 = vadd.f32 %v42_v2, %v41_v3  ;;  %p118_p3 = pnand %p117_p2, %p111_p13 }
  0x2d   :  { %v68_v5 = vmul.f32 -1.442695, %v43_v4 }
  0x2f   :  { %72 = vpow2.f32 %v68_v5 }
  0x39   :  { %v73_v6 = vpop.eup %72 }
  0x3a   :  { %v47_v7 = vadd.f32 1.0, %v73_v6 }
  0x3c   :  { %74 = vrcp.f32 %v47_v7 }
  0x46   :  { %v75_v8 = vpop.eup %74 }
  0x47   :  { %50 = vst [vmem:[#allocation7] sm:$0x1] %v75_v8 }
  0x48   :  { %121 = shalt.err (!%p118_p3)
}
  0x49   :  { %s122_s5 = scalar_lea.hbm %s185_s2, 16 }
  0x4a   :  { %p123_p4 = scmp.ne.s32.totalorder %s185_s2, %s122_s5  ;;  %p126_p5 = scmp.lt.u32.totalorder %s122_s5, %s185_s2 }
  0x4c   :  { %p128_p6 = pnand %p126_p5, %p123_p4 }
  0x4e   :  { %131 = shalt.err (!%p128_p6)
}
  0x4f   :  { %60 = dma.vmem_to_hbm [thread:$0]  %s58_s28, 16, %s185_s2, [#allocation4]  }
  0x50   :  { %136 = dma.done.wait [#allocation4], 16  }
  0x51   :  { %137 = vsyncadd [#allocation4], 4294967280 }
  0x52   :  { %64 = vsyncpa [#allocation3], 1 }
  0x53   :  { %65 = vsyncpa [#allocation4], 1 }
  0x54   :  { %66 = vsyncpa [#allocation5], 1 }

</bundles_post_ra>
